<compile_context>
chip_gen: v6e
topology: v6e:2x2x1
jax: 0.10.0
libtpu: 0.0.40
codegen_flags: <defaults>
</compile_context>

<pallas_src>
import jax
import jax.numpy as jnp
from jax.experimental import pallas as pl
from jax.experimental.pallas import tpu as pltpu


def _swat_pe_kernel(x_ref, idx_ref, *pe_and_out):
    # x_ref:   (rows, d_model)        current row tile of flattened x
    # idx_ref: (rows, n_trav) int32   traversal indices for those rows
    # pe_refs: T refs, each (S, d_i)  VMEM-resident PE tables
    # o_ref:   (rows, d_model)
    pe_refs, o_ref = pe_and_out[:-1], pe_and_out[-1]
    seq_len = pe_refs[0].shape[0]

    idx = idx_ref[...]                                           # (rows, T) int32
    col = jax.lax.broadcasted_iota(jnp.int32, (1, seq_len), 1)   # (1, S)

    embs = []
    for i, pe_ref in enumerate(pe_refs):
        pe = pe_ref[...]                                         # (S, d_i)
        # Exact "gather": 0/1 one-hot in the table dtype; HIGHEST for fp32
        # tables so PE values are not truncated, native bf16 MXU otherwise.
        prec = jax.lax.Precision.HIGHEST if pe.dtype == jnp.float32 else None
        onehot = (idx[:, i:i + 1] == col).astype(pe.dtype)       # (rows, S)
        embs.append(jnp.dot(onehot, pe,
                            preferred_element_type=jnp.float32,
                            precision=prec))                     # (rows, d_i) f32
    emb = jnp.concatenate(embs, axis=-1) if len(embs) > 1 else embs[0]
    o_ref[...] = (x_ref[...].astype(jnp.float32) + emb).astype(o_ref.dtype)


def _default_tile_bytes():
    # ~4 MiB of rows per step on big-VMEM chips (v5e/v6e: 128 MiB), ~2 MiB on
    # v7x (64 MiB) / unknown.
    try:
        info = pltpu.get_tpu_info()
        if int(getattr(info, "vmem_capacity_bytes", 0)) >= 100 * 1024 * 1024:
            return 4 * 1024 * 1024
    except Exception:
        pass
    return 2 * 1024 * 1024


def _resident_spec(shape):
    # Constant index_map -> table loaded once and kept resident; a second
    # pipeline buffer is pure waste, so request single buffering when supported.
    idx_map = lambda r: (0, 0)
    try:
        return pl.BlockSpec(shape, idx_map, pipeline_mode=pl.Buffered(1))
    except TypeError:  # older jax without pipeline_mode kwarg
        return pl.BlockSpec(shape, idx_map)


def swat_pe_encoder(x, indexes, pe_tables, *, target_tile_bytes=None):
    """x: [S, B, D]; indexes: [S, B, T] int in [0, S); pe_tables[i]: [S, d_i]."""
    seq_len, batch, d_model = x.shape
    n_trav = len(pe_tables)
    dims = [int(t.shape[1]) for t in pe_tables]
    assert indexes.shape == (seq_len, batch, n_trav)
    assert sum(dims) == d_model
    for t in pe_tables:
        assert t.shape[0] == seq_len

    if target_tile_bytes is None:
        target_tile_bytes = _default_tile_bytes()

    # Flatten (seq, batch) -> rows: sublane-dense tiles, lane dim = full d_model.
    n_rows = seq_len * batch
    x2 = x.reshape(n_rows, d_model)
    idx2 = indexes.reshape(n_rows, n_trav).astype(jnp.int32)

    # Row tile sized from the *fp32 intermediate* footprint per row
    # (one-hot(S) + emb(D) + fp32 x(D) + io tiles), multiple of 8 sublanes.
    itemsize = x.dtype.itemsize
    f32_row_bytes = 4 * (2 * d_model + seq_len + n_trav) + 2 * d_model * itemsize
    tile_rows = max(8, target_tile_bytes // max(f32_row_bytes, 1))
    if n_rows >= 16:
        # Keep grid >= 2 so v7x's second TensorCore has work ("parallel" axis).
        half_rows = (-(-((n_rows + 1) // 2) // 8)) * 8
        tile_rows = min(tile_rows, half_rows)
    tile_rows = min(tile_rows, n_rows)
    if tile_rows < n_rows:
        tile_rows = max(8, (tile_rows // 8) * 8)
    grid = (pl.cdiv(n_rows, tile_rows),)

    # VMEM limit from actual need (double-buffered io tiles + tables + scratch),
    # capped at 32 MiB so it stays a good fit for v7x's 64 MiB physical VMEM.
    table_bytes = sum(seq_len * d * t.dtype.itemsize for d, t in zip(dims, pe_tables))
    tile_io_bytes = tile_rows * (2 * d_model * itemsize + n_trav * 4)
    scratch_bytes = tile_rows * 4 * (seq_len + 2 * d_model)
    vmem_need = 2 * tile_io_bytes + 2 * table_bytes + scratch_bytes
    vmem_limit = int(min(32 * 1024 * 1024, max(16 * 1024 * 1024, 2 * vmem_need)))

    out2 = pl.pallas_call(
        _swat_pe_kernel,
        out_shape=jax.ShapeDtypeStruct((n_rows, d_model), x.dtype),
        grid_spec=pltpu.PrefetchScalarGridSpec(
            num_scalar_prefetch=0,
            grid=grid,
            in_specs=[
                pl.BlockSpec((tile_rows, d_model), lambda r: (r, 0)),
                pl.BlockSpec((tile_rows, n_trav), lambda r: (r, 0)),
                *[_resident_spec((seq_len, d)) for d in dims],
            ],
            out_specs=pl.BlockSpec((tile_rows, d_model), lambda r: (r, 0)),
        ),
        compiler_params=pltpu.CompilerParams(
            dimension_semantics=("parallel",),
            vmem_limit_bytes=vmem_limit,
        ),
    )(x2, idx2, *pe_tables)

    return out2.reshape(seq_len, batch, d_model)


if __name__ == "__main__":
    # Small shapes consistent with the module: seq=8, batch=2, d_model=32,
    # 3 traversals -> pe_dims as the module computes them: [10, 10, 12].
    seq_len, batch, d_model = 8, 2, 32
    n_trav = 3
    pe_dims = [d_model // n_trav] * n_trav
    pe_dims[-1] = d_model - pe_dims[0] * (n_trav - 1)

    key = jax.random.PRNGKey(0)
    kx, kidx, *kpe = jax.random.split(key, 2 + n_trav)

    x = jax.random.normal(kx, (seq_len, batch, d_model), dtype=jnp.float32)
    indexes = jax.random.randint(kidx, (seq_len, batch, n_trav), 0, seq_len,
                                 dtype=jnp.int32)
    pe_tables = [0.02 * jax.random.normal(k, (seq_len, d), dtype=jnp.float32)
                 for k, d in zip(kpe, pe_dims)]

    out = jax.block_until_ready(swat_pe_encoder(x, indexes, pe_tables))

    # Pure-JAX reference of the PyTorch forward (gather + concat + add).
    embs = [jnp.take(pe_tables[i], indexes[:, :, i], axis=0) for i in range(n_trav)]
    ref = x + jnp.concatenate(embs, axis=-1)

    assert out.shape == (seq_len, batch, d_model)
    assert jnp.allclose(out, ref, atol=1e-5, rtol=1e-5)
    print("KERNEL_OK")
</pallas_src>

<mosaic_0001>
module attributes {stable_mosaic.version = 11 : i64} {
  func.func @_swat_pe_kernel(%arg0: i32, %arg1: memref<8x32xf32, #tpu.memory_space<vmem>>, %arg2: memref<8x3xi32, #tpu.memory_space<vmem>>, %arg3: memref<8x10xf32, #tpu.memory_space<vmem>>, %arg4: memref<8x10xf32, #tpu.memory_space<vmem>>, %arg5: memref<8x12xf32, #tpu.memory_space<vmem>>, %arg6: memref<8x32xf32, #tpu.memory_space<vmem>>) attributes {dimension_semantics = [#tpu.dimension_semantics<parallel>], iteration_bounds = array<i64: 2>, scalar_prefetch = 0 : i64, scratch_operands = 0 : i64, tpu.core_type = #tpu.core_type<tc>, window_params = [{transform_indices = @transform_0, window_bounds = array<i64: 8, 32>}, {transform_indices = @transform_1, window_bounds = array<i64: 8, 3>}, {pipeline_mode = #tpu.pipeline_mode<synchronous>, transform_indices = @transform_2, window_bounds = array<i64: 8, 10>}, {pipeline_mode = #tpu.pipeline_mode<synchronous>, transform_indices = @transform_3, window_bounds = array<i64: 8, 10>}, {pipeline_mode = #tpu.pipeline_mode<synchronous>, transform_indices = @transform_4, window_bounds = array<i64: 8, 12>}, {transform_indices = @transform_5, window_bounds = array<i64: 8, 32>}]} {
    %c0 = arith.constant 0 : index
    %c0_0 = arith.constant 0 : index
    %0 = vector.load %arg2[%c0, %c0_0] : memref<8x3xi32, #tpu.memory_space<vmem>>, vector<8x3xi32>
    %1 = tpu.iota {dimensions = array<i32: 1>} : vector<1x8xi32>
    %c0_1 = arith.constant 0 : index
    %c0_2 = arith.constant 0 : index
    %2 = vector.load %arg3[%c0_1, %c0_2] : memref<8x10xf32, #tpu.memory_space<vmem>>, vector<8x10xf32>
    %3 = vector.extract_strided_slice %0 {offsets = [0, 0], sizes = [8, 1], strides = [1, 1]} : vector<8x3xi32> to vector<8x1xi32>
    %4 = vector.broadcast %3 : vector<8x1xi32> to vector<8x8xi32>
    %5 = vector.broadcast %1 : vector<1x8xi32> to vector<8x8xi32>
    %6 = arith.cmpi eq, %4, %5 : vector<8x8xi32>
    %7 = arith.extui %6 : vector<8x8xi1> to vector<8x8xi32>
    %8 = arith.sitofp %7 : vector<8x8xi32> to vector<8x8xf32>
    %cst = arith.constant dense<0.000000e+00> : vector<8x10xf32>
    %9 = tpu.matmul %8, %2, %cst {dimension_numbers = #tpu.dot_dimension_numbers<[1], [0], [0], [1], [0, 0, 1, 1], [], []>, precision = #tpu.contract_precision<fp32>} : vector<8x8xf32>, vector<8x10xf32>, vector<8x10xf32> -> vector<8x10xf32>
    %c0_3 = arith.constant 0 : index
    %c0_4 = arith.constant 0 : index
    %10 = vector.load %arg4[%c0_3, %c0_4] : memref<8x10xf32, #tpu.memory_space<vmem>>, vector<8x10xf32>
    %11 = vector.extract_strided_slice %0 {offsets = [0, 1], sizes = [8, 1], strides = [1, 1]} : vector<8x3xi32> to vector<8x1xi32>
    %12 = vector.broadcast %11 : vector<8x1xi32> to vector<8x8xi32>
    %13 = vector.broadcast %1 : vector<1x8xi32> to vector<8x8xi32>
    %14 = arith.cmpi eq, %12, %13 : vector<8x8xi32>
    %15 = arith.extui %14 : vector<8x8xi1> to vector<8x8xi32>
    %16 = arith.sitofp %15 : vector<8x8xi32> to vector<8x8xf32>
    %cst_5 = arith.constant dense<0.000000e+00> : vector<8x10xf32>
    %17 = tpu.matmul %16, %10, %cst_5 {dimension_numbers = #tpu.dot_dimension_numbers<[1], [0], [0], [1], [0, 0, 1, 1], [], []>, precision = #tpu.contract_precision<fp32>} : vector<8x8xf32>, vector<8x10xf32>, vector<8x10xf32> -> vector<8x10xf32>
    %c0_6 = arith.constant 0 : index
    %c0_7 = arith.constant 0 : index
    %18 = vector.load %arg5[%c0_6, %c0_7] : memref<8x12xf32, #tpu.memory_space<vmem>>, vector<8x12xf32>
    %19 = vector.extract_strided_slice %0 {offsets = [0, 2], sizes = [8, 1], strides = [1, 1]} : vector<8x3xi32> to vector<8x1xi32>
    %20 = vector.broadcast %19 : vector<8x1xi32> to vector<8x8xi32>
    %21 = vector.broadcast %1 : vector<1x8xi32> to vector<8x8xi32>
    %22 = arith.cmpi eq, %20, %21 : vector<8x8xi32>
    %23 = arith.extui %22 : vector<8x8xi1> to vector<8x8xi32>
    %24 = arith.sitofp %23 : vector<8x8xi32> to vector<8x8xf32>
    %cst_8 = arith.constant dense<0.000000e+00> : vector<8x12xf32>
    %25 = tpu.matmul %24, %18, %cst_8 {dimension_numbers = #tpu.dot_dimension_numbers<[1], [0], [0], [1], [0, 0, 1, 1], [], []>, precision = #tpu.contract_precision<fp32>} : vector<8x8xf32>, vector<8x12xf32>, vector<8x12xf32> -> vector<8x12xf32>
    %26 = tpu.concatenate %9, %17, %25 in 1 : vector<8x10xf32>, vector<8x10xf32>, vector<8x12xf32> -> vector<8x32xf32>
    %c0_9 = arith.constant 0 : index
    %c0_10 = arith.constant 0 : index
    %27 = vector.load %arg1[%c0_9, %c0_10] : memref<8x32xf32, #tpu.memory_space<vmem>>, vector<8x32xf32>
    %28 = arith.addf %27, %26 : vector<8x32xf32>
    %c0_11 = arith.constant 0 : index
    %c0_12 = arith.constant 0 : index
    %29 = vector.load %arg6[%c0_11, %c0_12] : memref<8x32xf32, #tpu.memory_space<vmem>>, vector<8x32xf32>
    tpu.vector_store %arg6[%c0_11, %c0_12], %28 {strides = array<i32>} : memref<8x32xf32, #tpu.memory_space<vmem>>, vector<8x32xf32>,
    return
  }
  func.func @transform_0(%arg0: i32) -> (i32, i32) {
    %c0_i32 = arith.constant 0 : i32
    %c0_i32_0 = arith.constant 0 : i32
    return %arg0, %c0_i32 : i32, i32
  }
  func.func @transform_1(%arg0: i32) -> (i32, i32) {
    %c0_i32 = arith.constant 0 : i32
    %c0_i32_0 = arith.constant 0 : i32
    return %arg0, %c0_i32 : i32, i32
  }
  func.func @transform_2(%arg0: i32) -> (i32, i32) {
    %c0_i32 = arith.constant 0 : i32
    %c0_i32_0 = arith.constant 0 : i32
    %c0_i32_1 = arith.constant 0 : i32
    return %c0_i32, %c0_i32_0 : i32, i32
  }
  func.func @transform_3(%arg0: i32) -> (i32, i32) {
    %c0_i32 = arith.constant 0 : i32
    %c0_i32_0 = arith.constant 0 : i32
    %c0_i32_1 = arith.constant 0 : i32
    return %c0_i32, %c0_i32_0 : i32, i32
  }
  func.func @transform_4(%arg0: i32) -> (i32, i32) {
    %c0_i32 = arith.constant 0 : i32
    %c0_i32_0 = arith.constant 0 : i32
    %c0_i32_1 = arith.constant 0 : i32
    return %c0_i32, %c0_i32_0 : i32, i32
  }
  func.func @transform_5(%arg0: i32) -> (i32, i32) {
    %c0_i32 = arith.constant 0 : i32
    %c0_i32_0 = arith.constant 0 : i32
    return %arg0, %c0_i32 : i32, i32
  }
}

</mosaic_0001>

<bundles_post_ra>
// kernel: tpu_custom_call.1
= control target key start
LH: loop header
LB: loop body
LE: loop exit
PB: predicated region body
PF: predicated region fallthrough
CT: control target
= control target key end

     0   :  { %10 = vsyncpa [#allocation3], 0  ;;  %s2380_s0 = inlined_call_operand.vmem [shape: f32[16,32], index: 0, kind: input, shape index: {}]   ;;  %s2381_s1 = inlined_call_operand.vmem [shape: s32[16,3], index: 1, kind: input, shape index: {}]   ;;  %s2382_s2 = inlined_call_operand.hbm [shape: f32[8,10], index: 2, kind: input, shape index: {}]   ;;  %s2383_s3 = inlined_call_operand.vmem [shape: f32[8,10], index: 3, kind: input, shape index: {}]   ;;  %s2384_s4 = inlined_call_operand.hbm [shape: f32[8,12], index: 4, kind: input, shape index: {}]   ;;  %s2385_s5 = inlined_call_operand.hbm [shape: f32[16,32], index: 5, kind: output, shape index: {}]  }
   0x1   :  { %11 = vsyncpa [#allocation6], 0 }
   0x2   :  { %12 = vsyncpa [#allocation4], 0 }
   0x3   :  { %14 = vsyncpa [#allocation4 + $0x1], 0  ;;  %s2144_s18 = smov 0   ;;  %s2146_s19 = smov 0  }
   0x4   :  { %s2148_s20 = smov 0   ;;  %s2150_s21 = smov 0  }
   0x5 LB: > { %s2165_s22 = sadd.s32 4294967295, %s2102_s21   ;;  %s1758_s23 = sadd.s32 4294967294, %s2102_s21   ;;  %s2102_s21 = sphi %s2150_s21, %s2403_s21   ;;  %s2098_s20 = sphi %s2148_s20, %s2402_s20   ;;  %s2094_s19 = sphi %s2146_s19, %s2401_s19   ;;  %s2090_s18 = sphi %s2144_s18, %s2400_s18  }
   0x6   : > { %s2169_s24 = sadd.s32 1, %s2102_s21   ;;  %s142_s25 = sadd.s32 1, %s2098_s20 }
   0x7   : > { %s139_s26 = ssub.s32 %s2102_s21, %s2169_s24  ;;  %p152_p0 = scmp.ne.s32.totalorder %s2098_s20, %s2094_s19 }
   0x8   : > { %p140_p1 = scmp.eq.s32.totalorder %s139_s26, 0  ;;  %p153_p2 = scmp.eq.s32.totalorder %s2165_s22, 1 }
   0x9   : > { %p158_p3 = scmp.ne.s32.totalorder %s2094_s19, %s2090_s18  ;;  %p159_p4 = scmp.eq.s32.totalorder %s1758_s23, 1 }
   0xa   : > { %s2180_s27 = scalar_select %p140_p1, %s2098_s20, %s142_s25  }
   0xb   : > { %p2182_p5 = por %p153_p2, %p152_p0  ;;  %p2186_p6 = por %p159_p4, %p158_p3 }
   0xc   : > { %p1759_p7 = scmp.ge.s32.totalorder %s2102_s21, 1  ;;  %p166_p8 = scmp.lt.s32.totalorder %s2102_s21, 3 }
   0xd   : > { %s2389_s28 = scalar_select %p2182_p5, 1, 0 }
   0xe   : > { %s2390_s29 = scalar_select %p2186_p6, 1, 0 }
   0xf   : > { %p2386_p9 = scmp.eq.s32.totalorder %s2165_s22, 0  ;;  %p2193_p10 = pnand %p1759_p7, %p166_p8 }
  0x10   : > { %s2104_s6 = smov [#allocation2]   ;;  %s2105_s8 = smov [#allocation5]  }
  0x11   : > { %s2391_s30 = scalar_select %p2193_p10, 1, 0 }
  0x12   : > { %s179_s7 = sshll.u32 %s2104_s6, 4  ;;  %p1921_p11 = pneg %p2193_p10  ;;  %s180_s7 = int_to_ptr.vmem [resolvable:$true] %s179_s7 }
  0x13   : > { %s193_s9 = sshll.u32 %s2105_s8, 4  ;;  %s1993_s11 = scalar_lea.vmem %s180_s7, 128  ;;  %s194_s9 = int_to_ptr.vmem [resolvable:$true] %s193_s9 }
  0x14   : > { %p2201_p12 = pnand %p2386_p9, %p1921_p11  ;;  %p1994_p0 = scmp.ne.s32.totalorder %s180_s7, %s1993_s11 }
  0x15   : > { %p2001_p3 = scmp.lt.s32.totalorder %s180_s7, %s180_s7  ;;  %p2002_p4 = scmp.lt.s32.totalorder %s1993_s11, %s1993_s11 }
  0x16   : > { %p1984_p13 = pneg %p2201_p12 }
  0x17   : > { %p2003_p7 = por %p2002_p4, %p2001_p3 }
  0x18   : > { %p1996_p1 = pnand %p1994_p0, %p1984_p13 }
  0x1a   : > { %p1997_p2 = pneg %p1996_p1 }
  0x1c   : > { %p2004_p8 = pnand %p2003_p7, %p1997_p2 }
  0x1e   : > { %2007 = shalt.err (!%p2004_p8)
}
  0x1f   : > { %1924 = dma.hbm_to_vmem [thread:$0]  (!%p2201_p12), %s2382_s2, 128, %s180_s7, [#allocation3]  }
  0x20   : > { %s2019_s14 = scalar_lea.vmem %s194_s9, 128  ;;  %p2027_p0 = scmp.lt.s32.totalorder %s194_s9, %s194_s9 }
  0x21   : > { %p2020_p11 = scmp.ne.s32.totalorder %s194_s9, %s2019_s14  ;;  %p2028_p1 = scmp.lt.s32.totalorder %s2019_s14, %s2019_s14 }
  0x23   : > { %p2022_p9 = pnand %p2020_p11, %p1984_p13  ;;  %p2029_p5 = por %p2028_p1, %p2027_p0 }
  0x25   : > { %p2023_p6 = pneg %p2022_p9 }
  0x27   : > { %p2030_p10 = pnand %p2029_p5, %p2023_p6 }
  0x29   : > { %2033 = shalt.err (!%p2030_p10)
}
  0x2a   : > { %1927 = dma.hbm_to_vmem [thread:$0]  (!%p2201_p12), %s2384_s4, 128, %s194_s9, [#allocation6]  }
  0x2b   : > { %p2393_p2 = scmp.ne.s32.totalorder %s2391_s30, 0 }
  0x2c   : > { %p2394_p3 = scmp.eq.s32.totalorder (!%p2393_p2), %s2165_s22, 0 }
  0x2d   : > { %220 = sbr.rel (%p2393_p2) target bundleno = 556 (0x22c), region = 40 }
  0x32   : > { %2077 = dma.done.wait (%p2394_p3), [#allocation3], 128   ;;  %p2395_p13 = pmov %p2394_p3 }
  0x33   : > { %p2396_p9 = pmov %p2394_p3 }
  0x34   : > { %2079 = vsyncadd (%p2395_p13), [#allocation3], 4294967168 }
  0x35   : > { %2081 = dma.done.wait (%p2396_p9), [#allocation6], 128   ;;  %p2397_p5 = pmov %p2394_p3 }
  0x36   : > { %p255_p6 = scmp.lt.s32.totalorder %s2165_s22, 1  ;;  %v2106_v0 = vmov 0   ;;  %v2107_v1 = vmov 2   ;;  %v2108_v2 = vmov 0.0   ;;  %vm2109_vm0 = vmmov 0   ;;  %v266_v4 = vld [vmem:[#allocation2] sm:$0xff] }
  0x37   : > { %2083 = vsyncadd (%p2397_p5), [#allocation6], 4294967168  ;;  %1978 = vset.pattern.permute.xlu0 %v2106_v0  ;;  %1980 = vset.pattern.permute.xlu1 %v2107_v1  ;;  %v308_v5 = vand.u32 4294901760, %v266_v4  ;;  %v2110_v7 = vmov 1   ;;  %v723_v11 = vld [vmem:[%s2383_s3] sm:$0xff]  ;;  %v264_v12 = vlaneseq  ;;  %vm273_vm1 = vcmask 64512  }
  0x38   : > { %s2235_s17 = scalar_select %p255_p6, %s2165_s22, 1  ;;  %1826 = vmatprep.subr.mxu1 %v2108_v2  ;;  %1821 = vmatprep.subr.mxu0 %v2108_v2  ;;  %v764_v13 = vand.u32 4294901760, %v723_v11  ;;  %v1179_v20 = vld [vmem:[#allocation5] sm:$0xff]  ;;  %vm1643_vm5 = vcmask 80896   ;;  %vm1645_vm6 = vcmask 162816   ;;  %vm1649_vm7 = vcmask 261120  }
  0x39   : > { %1828 = vmatprep.mubr.msk.f32.mxu1 %vm2109_vm0, %v2108_v2  ;;  %1823 = vmatprep.mubr.msk.f32.mxu0 %vm2109_vm0, %v2108_v2  ;;  %v385_v6 = vsub.f32 %v266_v4, %v308_v5  ;;  %v265_v14 = vand.u32 127, %v264_v12  ;;  %v2266_v25 = vand.u32 4294901760, %v1179_v20  ;;  %s2111_s8 = smov 10   ;;  %s2112_s9 = smov 20  }
  0x3a   : > { %s1767_s23 = sshll.u32 %s2235_s17, 3  ;;  %1822 = vmatpush3.msra.mxu0 %v308_v5  ;;  %v2254_v15 = vsub.f32 %v723_v11, %v764_v13  ;;  %s252_s10 = sand.u32 1, %s2094_s19  }
  0x3b   : > { %s262_s30 = scalar_lea.vmem %s2381_s1, %s1767_s23  ;;  %1831 = vmatprep.subr.mxu0 %v2108_v2  ;;  %v386_v8 = vand.u32 4294901760, %v385_v6  ;;  %v2277_v33 = vsub.f32 %v1179_v20, %v2266_v25  ;;  %s1766_s11 = sshll.u32 %s252_s10, 3 }
  0x3c   : > { %v263_v3 = vld [vmem:[%s262_s30] sm:$0xff]  ;;  %v842_v18 = vand.u32 4294901760, %v2254_v15  ;;  %s258_s14 = scalar_lea.vmem %s2380_s0, %s1767_s23  ;;  %s1782_s15 = sshll.u32 %s2165_s22, 7 }
  0x3d   : > { %268 = vperm.xlu0 %1978, %v263_v3   ;;  %1181 = vperm.xlu1 %1980, %v263_v3   ;;  %v387_v9 = vsub.f32 %v385_v6, %v386_v8  ;;  %v1298_v35 = vand.u32 4294901760, %v2277_v33  ;;  %s254_s16 = scalar_lea.vmem [#allocation7], %s1766_s11  ;;  %s1663_s17 = scalar_lea.hbm %s2385_s5, %s1782_s15 }
  0x3e   : > { %v843_v24 = vsub.f32 %v2254_v15, %v842_v18  ;;  %s1665_s25 = sshll.u32 %s254_s16, 4  ;;  %s1652_s6 = scalar_lea.sflag [#allocation4], %s252_s10  ;;  %s1666_s25 = int_to_ptr.vmem [resolvable:$true] %s1665_s25 }
  0x3f   : > { %v388_v10 = vand.u32 4294901760, %v387_v9  ;;  %v1299_v38 = vsub.f32 %v2277_v33, %v1298_v35  ;;  %s2034_s23 = scalar_lea.vmem %s1666_s25, 128  ;;  %p2398_p12 = scmp.ne.s32.totalorder %s2389_s28, 0 }
  0x40   : > { %v844_v31 = vand.u32 4294901760, %v843_v24  ;;  %p2035_p10 = scmp.ne.s32.totalorder %s1666_s25, %s2034_s23  ;;  %s2113_s22 = smov [#allocation7]  }
  0x41   : > { %1979 = vset.pattern.permute.xlu0 %v2110_v7  ;;  %1827 = vmatpush3.msra.mxu1 %v388_v10  ;;  %v1300_v42 = vand.u32 4294901760, %v1299_v38  ;;  %s2038_s7 = sshll.u32 %s2113_s22, 4  ;;  %s2039_s7 = int_to_ptr.vmem [resolvable:$false] %s2038_s7 }
  0x42   : > { %725 = vperm.xlu0 %1979, %v263_v3   ;;  %1836 = vmatprep.subr.mxu1 %v2108_v2  ;;  %p2036_p4 = pnand %p2035_p10, %p2398_p12  ;;  %p2041_p8 = scmp.lt.s32.totalorder %s1666_s25, %s2039_s7 }
  0x44   : > { %p2037_p7 = pneg %p2036_p4 }
  0x46   : > { %1981 = vset.pattern.permute.xlu0 %v2107_v1 }
  0xb8   : > { %v269_v16 = vpop.permute.xlu0 %268  ;;  %v1182_v32 = vpop.permute.xlu1 %1181 }
  0xb9   : > { %vm270_vm2 = vcmp.eq.s32.totalorder %v269_v16, %v265_v14  ;;  %vm1183_vm4 = vcmp.eq.s32.totalorder %v1182_v32, %v265_v14 }
  0xba   : > { %v1769_v17 = vsel %vm270_vm2, 1.0, %v2108_v2  ;;  %v1777_v36 = vsel %vm1183_vm4, 1.0, %v2108_v2 }
  0xbb   : > { %v275_v19 = vsel %vm273_vm1, %v1769_v17, 0  ;;  %1829 = vmatmul.mubr.msk.f32.vlgmr.msra.gmra.mxu1 %vm273_vm1, %v1769_v17  ;;  %v1187_v39 = vsel %vm273_vm1, %v1777_v36, 0 }
  0xbc   : > { %v344_v21 = vsub.f32 %v275_v19, %v275_v19  ;;  %1837 = vmatpush3.msra.mxu1 %v308_v5  ;;  %1838 = vmatprep.mubr.msk.f32.mxu1 %vm2109_vm0, %v2108_v2  ;;  %v1256_v40 = vsub.f32 %v1187_v39, %v1187_v39 }
  0xbd   : > { %1846 = vmatprep.subr.mxu1 %v2108_v2  ;;  %v726_v22 = vpop.permute.xlu0 %725 }
  0xbe   : > { %v345_v23 = vand.u32 4294901760, %v344_v21  ;;  %vm727_vm3 = vcmp.eq.s32.totalorder %v726_v22, %v265_v14  ;;  %v1257_v43 = vand.u32 4294901760, %v1256_v40 }
  0xbf   : > { %v2269_v26 = vsel %vm727_vm3, 1.0, %v2108_v2 }
  0xc0   : > { %1839 = vmatmul.mubr.f32.vlgmr.msra.gmra.mxu1 %v345_v23  ;;  %v731_v27 = vsel %vm273_vm1, %v2269_v26, 0  ;;  %v346_v28 = vsub.f32 %v344_v21, %v345_v23  ;;  %v1258_v44 = vsub.f32 %v1256_v40, %v1257_v43 }
  0xc1   : > { %1847 = vmatpush3.msra.mxu1 %v308_v5  ;;  %1848 = vmatprep.mubr.msk.f32.mxu1 %vm2109_vm0, %v2108_v2  ;;  %v800_v29 = vsub.f32 %v731_v27, %v731_v27 }
  0xc2   : > { %v347_v30 = vand.u32 4294901760, %v346_v28  ;;  %1856 = vmatprep.subr.mxu1 %v2108_v2  ;;  %v1259_v45 = vand.u32 4294901760, %v1258_v44 }
  0xc3   : > { %v801_v34 = vand.u32 4294901760, %v800_v29 }
  0xc4   : > { %1824 = vmatmul.mubr.f32.vlgmr.msra.gmra.mxu0 %v347_v30  ;;  %1849 = vmatmul.mubr.msk.f32.vlgmr.msra.gmra.mxu1 %vm273_vm1, %v1769_v17 }
  0xc5   : > { %1832 = vmatpush3.msra.mxu0 %v385_v6  ;;  %1833 = vmatprep.mubr.msk.f32.mxu0 %vm2109_vm0, %v2108_v2  ;;  %v802_v37 = vsub.f32 %v800_v29, %v801_v34 }
  0xc6   : > { %1841 = vmatprep.subr.mxu0 %v2108_v2  ;;  %1857 = vmatpush3.msra.mxu1 %v844_v31 }
  0xc7   : > { %1858 = vmatprep.mubr.msk.f32.mxu1 %vm2109_vm0, %v2108_v2  ;;  %1866 = vmatprep.subr.mxu1 %v2108_v2  ;;  %v803_v41 = vand.u32 4294901760, %v802_v37 }
  0xc8   : > { %1834 = vmatmul.mubr.f32.vlgmr.msra.gmra.mxu0 %v344_v21  ;;  %1859 = vmatmul.mubr.msk.f32.vlgmr.msra.gmra.mxu1 %vm273_vm1, %v2269_v26 }
  0xc9   : > { %1842 = vmatpush3.msra.mxu0 %v386_v8  ;;  %1843 = vmatprep.mubr.msk.f32.mxu0 %vm2109_vm0, %v2108_v2 }
  0xca   : > { %1851 = vmatprep.subr.mxu0 %v2108_v2  ;;  %1867 = vmatpush3.msra.mxu1 %v764_v13 }
  0xcb   : > { %1868 = vmatprep.mubr.msk.f32.mxu1 %vm2109_vm0, %v2108_v2  ;;  %1876 = vmatprep.subr.mxu1 %v2108_v2 }
  0xcc   : > { %1844 = vmatmul.mubr.msk.f32.vlgmr.msra.gmra.mxu0 %vm273_vm1, %v1769_v17  ;;  %1869 = vmatmul.mubr.f32.vlgmr.msra.gmra.mxu1 %v801_v34  ;;  %v1647_v34 = vld [vmem:[%s258_s14] sm:$0xff] }
  0xcd   : > { %1852 = vmatpush3.msra.mxu0 %v764_v13  ;;  %1853 = vmatprep.mubr.msk.f32.mxu0 %vm2109_vm0, %v2108_v2 }
  0xce   : > { %1861 = vmatprep.subr.mxu0 %v2108_v2  ;;  %1877 = vmatpush3.msra.mxu1 %v764_v13 }
  0xcf   : > { %1878 = vmatprep.mubr.msk.f32.mxu1 %vm2109_vm0, %v2108_v2  ;;  %1886 = vmatprep.subr.mxu1 %v2108_v2 }
  0xd0   : > { %1854 = vmatmul.mubr.f32.vlgmr.msra.gmra.mxu0 %v803_v41  ;;  %1879 = vmatmul.mubr.msk.f32.vlgmr.msra.gmra.mxu1 %vm273_vm1, %v2269_v26 }
  0xd1   : > { %1862 = vmatpush3.msra.mxu0 %v2254_v15  ;;  %1863 = vmatprep.mubr.msk.f32.mxu0 %vm2109_vm0, %v2108_v2 }
  0xd2   : > { %1871 = vmatprep.subr.mxu0 %v2108_v2  ;;  %1887 = vmatpush3.msra.mxu1 %v1300_v42 }
  0xd3   : > { %1888 = vmatprep.mubr.msk.f32.mxu1 %vm2109_vm0, %v2108_v2  ;;  %1896 = vmatprep.subr.mxu1 %v2108_v2 }
  0xd4   : > { %1864 = vmatmul.mubr.f32.vlgmr.msra.gmra.mxu0 %v800_v29  ;;  %1889 = vmatmul.mubr.msk.f32.vlgmr.msra.gmra.mxu1 %vm273_vm1, %v1777_v36 }
  0xd5   : > { %1872 = vmatpush3.msra.mxu0 %v842_v18  ;;  %1873 = vmatprep.mubr.msk.f32.mxu0 %vm2109_vm0, %v2108_v2 }
  0xd6   : > { %1881 = vmatprep.subr.mxu0 %v2108_v2  ;;  %1897 = vmatpush3.msra.mxu1 %v2266_v25 }
  0xd7   : > { %1898 = vmatprep.mubr.msk.f32.mxu1 %vm2109_vm0, %v2108_v2  ;;  %1906 = vmatprep.subr.mxu1 %v2108_v2 }
  0xd8   : > { %1874 = vmatmul.mubr.msk.f32.vlgmr.msra.gmra.mxu0 %vm273_vm1, %v2269_v26  ;;  %1899 = vmatmul.mubr.f32.vlgmr.msra.gmra.mxu1 %v1257_v43 }
  0xd9   : > { %1882 = vmatpush3.msra.mxu0 %v2266_v25  ;;  %1883 = vmatprep.mubr.msk.f32.mxu0 %vm2109_vm0, %v2108_v2 }
  0xda   : > { %1891 = vmatprep.subr.mxu0 %v2108_v2  ;;  %1907 = vmatpush3.msra.mxu1 %v2266_v25 }
  0xdb   : > { %1908 = vmatprep.mubr.msk.f32.mxu1 %vm2109_vm0, %v2108_v2 }
  0xdc   : > { %1884 = vmatmul.mubr.f32.vlgmr.msra.gmra.mxu0 %v1259_v45  ;;  %1909 = vmatmul.mubr.msk.f32.vlgmr.msra.gmra.mxu1 %vm273_vm1, %v1777_v36 }
  0xdd   : > { %1892 = vmatpush3.msra.mxu0 %v2277_v33  ;;  %1893 = vmatprep.mubr.msk.f32.mxu0 %vm2109_vm0, %v2108_v2 }
  0xde   : > { %1901 = vmatprep.subr.mxu0 %v2108_v2 }
  0xe0   : > { %1894 = vmatmul.mubr.f32.vlgmr.msra.gmra.mxu0 %v1256_v40 }
  0xe1   : > { %1902 = vmatpush3.msra.mxu0 %v1298_v35  ;;  %1903 = vmatprep.mubr.msk.f32.mxu0 %vm2109_vm0, %v2108_v2 }
  0xe4   : > { %1904 = vmatmul.mubr.msk.f32.vlgmr.msra.gmra.mxu0 %vm273_vm1, %v1777_v36 }
 0x17b   : > { %v425_v46 = vpop.f32.mrf.mxu1 }
 0x17d   : > { %v1830_v47 = vpop.f32.mrf.mxu1 }
 0x180   : > { %v573_v48 = vpop.f32.mrf.mxu1 }
 0x182   : > { %v1840_v49 = vpop.f32.mrf.mxu1 }
 0x184   : > { %v349_v50 = vpop.f32.mrf.mxu0  ;;  %v719_v51 = vpop.f32.mrf.mxu1 }
 0x185   : > { %v426_v52 = vadd.f32 %v425_v46, %v349_v50 }
 0x186   : > { %v1825_v53 = vpop.f32.mrf.mxu0  ;;  %v1850_v54 = vpop.f32.mrf.mxu1 }
 0x188   : > { %v499_v55 = vpop.f32.mrf.mxu0  ;;  %v881_v56 = vpop.f32.mrf.mxu1 }
 0x189   : > { %v500_v57 = vadd.f32 %v499_v55, %v426_v52 }
 0x18a   : > { %v1835_v58 = vpop.f32.mrf.mxu0  ;;  %v1860_v59 = vpop.f32.mrf.mxu1 }
 0x18b   : > { %v574_v60 = vadd.f32 %v573_v48, %v500_v57 }
 0x18c   : > { %v647_v61 = vpop.f32.mrf.mxu0  ;;  %v1029_v62 = vpop.f32.mrf.mxu1 }
 0x18d   : > { %v648_v63 = vadd.f32 %v647_v61, %v574_v60 }
 0x18e   : > { %v1845_v0 = vpop.f32.mrf.mxu0  ;;  %v1870_v1 = vpop.f32.mrf.mxu1 }
 0x18f   : > { %v720_v2 = vadd.f32 %v719_v51, %v648_v63 }
 0x190   : > { %v805_v3 = vpop.f32.mrf.mxu0  ;;  %v1175_v4 = vpop.f32.mrf.mxu1 }
 0x191   : > { %v882_v7 = vadd.f32 %v881_v56, %v805_v3 }
 0x192   : > { %v1855_v5 = vpop.f32.mrf.mxu0  ;;  %v1880_v6 = vpop.f32.mrf.mxu1 }
 0x194   : > { %v955_v8 = vpop.f32.mrf.mxu0  ;;  %v1337_v9 = vpop.f32.mrf.mxu1 }
 0x195   : > { %v956_v10 = vadd.f32 %v955_v8, %v882_v7 }
 0x196   : > { %v1865_v11 = vpop.f32.mrf.mxu0  ;;  %v1890_v12 = vpop.f32.mrf.mxu1 }
 0x197   : > { %v1030_v13 = vadd.f32 %v1029_v62, %v956_v10 }
 0x198   : > { %v1103_v14 = vpop.f32.mrf.mxu0  ;;  %v1485_v15 = vpop.f32.mrf.mxu1 }
 0x199   : > { %v1104_v16 = vadd.f32 %v1103_v14, %v1030_v13 }
 0x19a   : > { %v1875_v17 = vpop.f32.mrf.mxu0  ;;  %v1900_v18 = vpop.f32.mrf.mxu1 }
 0x19b   : > { %v1176_v19 = vadd.f32 %v1175_v4, %v1104_v16 }
 0x19c   : > { %v1261_v20 = vpop.f32.mrf.mxu0  ;;  %v1631_v21 = vpop.f32.mrf.mxu1 }
 0x19d   : > { %1636 = vrot.lane.b32.xlu1 %v1176_v19, %s2111_s8  ;;  %v1338_v24 = vadd.f32 %v1337_v9, %v1261_v20  ;;  %s2040_s8 = scalar_lea.vmem %s2039_s7, 256 }
 0x19e   : > { %v1885_v22 = vpop.f32.mrf.mxu0  ;;  %v1910_v23 = vpop.f32.mrf.mxu1  ;;  %p2042_p11 = scmp.lt.s32.totalorder %s2040_s8, %s2034_s23 }
 0x1a0   : > { %v1411_v25 = vpop.f32.mrf.mxu0  ;;  %p2043_p0 = por %p2042_p11, %p2041_p8 }
 0x1a1   : > { %v1412_v26 = vadd.f32 %v1411_v25, %v1338_v24 }
 0x1a2   : > { %v1895_v27 = vpop.f32.mrf.mxu0  ;;  %p2044_p1 = pnand %p2043_p0, %p2037_p7 }
 0x1a3   : > { %v1486_v28 = vadd.f32 %v1485_v15, %v1412_v26 }
 0x1a4   : > { %v1559_v29 = vpop.f32.mrf.mxu0 }
 0x1a5   : > { %v1560_v30 = vadd.f32 %v1559_v29, %v1486_v28 }
 0x1a6   : > { %v1905_v31 = vpop.f32.mrf.mxu0 }
 0x1a7   : > { %v1632_v32 = vadd.f32 %v1631_v21, %v1560_v30 }
 0x1a9   : > { %1640 = vrot.lane.b32.xlu1 %v1632_v32, %s2112_s9 }
 0x20f   : > { %v1637_v33 = vpop.permute.xlu1 %1636 }
 0x210   : > { %v1644_v35 = vsel %vm1643_vm5, %v720_v2, %v1637_v33 }
 0x21b   : > { %v1641_v36 = vpop.permute.xlu1 %1640 }
 0x21c   : > { %v1646_v37 = vsel %vm1645_vm6, %v1644_v35, %v1641_v36 }
 0x21d   : > { %v1648_v38 = vadd.f32 %v1647_v34, %v1646_v37 }
 0x21f   : > { %1650 = vst.msk [vmem:[%s254_s16] sm:$0xff] %vm1649_vm7, %v1648_v38 }
 0x220   : > { %2047 = shalt.err (!%p2044_p1)
}
 0x221   : > { %s2048_s9 = scalar_lea.hbm %s1663_s17, 128  ;;  %s2052_s12 = scalar_lea.hbm %s2385_s5, 256 }
 0x222   : > { %p2049_p2 = scmp.ne.s32.totalorder %s1663_s17, %s2048_s9  ;;  %p2053_p9 = scmp.lt.s32.totalorder %s1663_s17, %s2385_s5 }
 0x223   : > { %p2054_p5 = scmp.lt.s32.totalorder %s2052_s12, %s2048_s9 }
 0x224   : > { %p2050_p3 = pnand %p2049_p2, %p2398_p12 }
 0x225   : > { %p2055_p6 = por %p2054_p5, %p2053_p9 }
 0x226   : > { %p2051_p13 = pneg %p2050_p3 }
 0x228   : > { %p2056_p10 = pnand %p2055_p6, %p2051_p13 }
 0x22a   : > { %2059 = shalt.err (!%p2056_p10)
}
 0x22b   : > { %1919 = dma.vmem_to_hbm [thread:$0]  (%p2398_p12), %s1666_s25, 128, %s1663_s17, %s1652_s6  }
 0x22c PF: > { %p1936_p4 = scmp.ge.s32.totalorder %s2102_s21, 2  ;;  %s1677_s15 = sand.u32 1, %s2090_s18  }
 0x22d   : > { %p2399_p7 = scmp.ne.s32.totalorder %s2390_s29, 0  ;;  %s1678_s16 = scalar_lea.sflag [#allocation4], %s1677_s15 }
 0x22f   : > { %p1929_p8 = pnand %p1936_p4, %p2399_p7 }
 0x231   : > { %p1930_p11 = pneg %p1929_p8 }
 0x233   : > { %2085 = dma.done.wait (%p1930_p11), %s1678_s16, 128  }
 0x234   : > { %2087 = vsyncadd (%p1930_p11), %s1678_s16, 4294967168  ;;  %p17_p0 = scmp.ge.s32.totalorder %s2169_s24, 4   ;;  %s2400_s18 = smov %s2094_s19 }
 0x235   : > { %s2401_s19 = smov %s2098_s20  ;;  %s2402_s20 = smov %s2180_s27 }
 0x236   : > { %s2403_s21 = smov %s2169_s24  ;;  %19 = sbr.rel (!%p17_p0) target bundleno = 5 (0x5), region = 87 }
 0x23b   :  { %1683 = vsyncpa [#allocation3], 1 }
 0x23c   :  { %1685 = vsyncpa [#allocation3 + $0x1], 1 }
 0x23d   :  { %1686 = vsyncpa [#allocation6], 1 }
 0x23e   :  { %1687 = vsyncpa [#allocation4], 1 }
 0x23f   :  { %1689 = vsyncpa [#allocation4 + $0x1], 1 }

</bundles_post_ra>
